<compile_context>
chip_gen: v6e
topology: v6e:2x2x1
jax: 0.10.0
libtpu: 0.0.40
codegen_flags: <defaults>
</compile_context>

<pallas_src>
import jax
import jax.numpy as jnp
from jax.experimental import pallas as pl
from jax.experimental.pallas import tpu as pltpu


def _concat_block_kernel(cols_ref, xflat_ref, w_ref, out_ref):
    # cols_ref:  (1, Cin*9 + 1, H*W)  im2col slab (+ ones row folding the bias)
    # xflat_ref: (1, Cin, H*W)        unpadded input, flattened spatially
    # w_ref:     (Cout, Cin*9 + 1)    flattened conv weights (+ bias column)
    # out_ref:   (1, Cout + Cin, H*W)
    cout = w_ref.shape[0]

    # Single MXU matmul: conv(x) + bias in one shot, f32 accumulation.
    conv = jnp.dot(w_ref[...], cols_ref[0],
                   preferred_element_type=jnp.float32)   # (Cout, H*W)

    # concat([m(x), x], dim=1): both writes are lane-dense (256 lanes).
    out_ref[0, :cout] = conv.astype(out_ref.dtype)        # m(x) half
    out_ref[0, cout:] = xflat_ref[0]                       # identity half


def concat_block(x, w, b):
    """x: (N, C, H, W) f32, w: (Cout, C, 3, 3), b: (Cout,) -> (N, Cout+C, H, W)."""
    N, C, H, W = x.shape
    Cout = w.shape[0]
    HW = H * W
    K = C * 9 + 1  # Cin*9 taps + 1 ones-row for the bias

    # Wrapper-side im2col (lane-dense):
    #   cols[n, c*9 + kh*3 + kw, h*W + w] = xpad[n, c, h+kh, w+kw]
    xpad = jnp.pad(x, ((0, 0), (0, 0), (1, 1), (1, 1)))
    taps = [xpad[:, :, kh:kh + H, kw:kw + W]
            for kh in range(3) for kw in range(3)]
    cols = jnp.stack(taps, axis=2).reshape(N, C * 9, HW)
    cols = jnp.concatenate([cols, jnp.ones((N, 1, HW), cols.dtype)], axis=1)

    # Flatten weights to match the (c, kh, kw) ordering above; append bias col.
    w_aug = jnp.concatenate([w.reshape(Cout, C * 9), b[:, None]], axis=1)

    # Unpadded x, flattened, for the identity half of the concat.
    xflat = x.reshape(N, C, HW)

    # Note: on v6e/v7x, casting cols/w_aug to bfloat16 here (keeping
    # preferred_element_type=f32) would use the bf16-native MXU; kept f32 to
    # match the PyTorch module's f32 semantics exactly.

    out2d = pl.pallas_call(
        _concat_block_kernel,
        out_shape=jax.ShapeDtypeStruct((N, Cout + C, HW), x.dtype),
        grid_spec=pltpu.PrefetchScalarGridSpec(
            num_scalar_prefetch=0,
            grid=(N,),
            in_specs=[
                pl.BlockSpec((1, K, HW), lambda n: (n, 0, 0)),
                pl.BlockSpec((1, C, HW), lambda n: (n, 0, 0)),
                pl.BlockSpec((Cout, K), lambda n: (0, 0)),  # resident weights
            ],
            out_specs=pl.BlockSpec((1, Cout + C, HW), lambda n: (n, 0, 0)),
        ),
        compiler_params=pltpu.CompilerParams(
            dimension_semantics=("parallel",)),
    )(cols, xflat, w_aug)

    return out2d.reshape(N, Cout + C, H, W)


# Jit the whole wrapper so im2col + pallas_call compile into one XLA program
# (cols never round-trips through a separate dispatch).
concat_block = jax.jit(concat_block)


def _reference(x, w, b):
    # Pure-JAX reference: Conv2d(C, C, 3, padding=1) then channel concat.
    y = jax.lax.conv_general_dilated(
        x, w, window_strides=(1, 1), padding="SAME",
        dimension_numbers=("NCHW", "OIHW", "NCHW"))
    y = y + b[None, :, None, None]
    return jnp.concatenate([y, x], axis=1)


if __name__ == "__main__":
    key = jax.random.PRNGKey(0)
    kx, kw, kb = jax.random.split(key, 3)

    N, C, H, W = 2, 4, 16, 16
    x = jax.random.normal(kx, (N, C, H, W), dtype=jnp.float32)

    # Deterministic Conv2d(C, C, 3, padding=1) init (Kaiming-uniform-ish bound).
    fan_in = C * 3 * 3
    bound = 1.0 / (fan_in ** 0.5)
    w = jax.random.uniform(kw, (C, C, 3, 3), minval=-bound, maxval=bound,
                           dtype=jnp.float32)
    b = jax.random.uniform(kb, (C,), minval=-bound, maxval=bound,
                           dtype=jnp.float32)

    out = concat_block(x, w, b)
    out = jax.block_until_ready(out)

    ref = _reference(x, w, b)
    assert out.shape == (N, 2 * C, H, W), out.shape
    assert jnp.allclose(out, ref, atol=1e-5, rtol=1e-5), "mismatch vs reference"

    print("KERNEL_OK")
</pallas_src>

<mosaic_0001>
module attributes {stable_mosaic.version = 11 : i64} {
  func.func @_concat_block_kernel(%arg0: i32, %arg1: memref<1x37x256xf32, #tpu.memory_space<vmem>>, %arg2: memref<1x4x256xf32, #tpu.memory_space<vmem>>, %arg3: memref<4x37xf32, #tpu.memory_space<vmem>>, %arg4: memref<1x8x256xf32, #tpu.memory_space<vmem>>) attributes {dimension_semantics = [#tpu.dimension_semantics<parallel>], iteration_bounds = array<i64: 2>, scalar_prefetch = 0 : i64, scratch_operands = 0 : i64, tpu.core_type = #tpu.core_type<tc>, window_params = [{transform_indices = @transform_0, window_bounds = array<i64: 1, 37, 256>}, {transform_indices = @transform_1, window_bounds = array<i64: 1, 4, 256>}, {pipeline_mode = #tpu.pipeline_mode<synchronous>, transform_indices = @transform_2, window_bounds = array<i64: 4, 37>}, {transform_indices = @transform_3, window_bounds = array<i64: 1, 8, 256>}]} {
    %c0 = arith.constant 0 : index
    %c0_0 = arith.constant 0 : index
    %0 = vector.load %arg3[%c0, %c0_0] : memref<4x37xf32, #tpu.memory_space<vmem>>, vector<4x37xf32>
    %c0_1 = arith.constant 0 : index
    %c0_2 = arith.constant 0 : index
    %c0_3 = arith.constant 0 : index
    %1 = vector.load %arg1[%c0_1, %c0_2, %c0_3] : memref<1x37x256xf32, #tpu.memory_space<vmem>>, vector<1x37x256xf32>
    %2 = vector.shape_cast %1 : vector<1x37x256xf32> to vector<37x256xf32>
    %cst = arith.constant dense<0.000000e+00> : vector<4x256xf32>
    %3 = tpu.matmul %0, %2, %cst {dimension_numbers = #tpu.dot_dimension_numbers<[1], [0], [0], [1], [0, 0, 1, 1], [], []>} : vector<4x37xf32>, vector<37x256xf32>, vector<4x256xf32> -> vector<4x256xf32>
    %c0_4 = arith.constant 0 : index
    %c0_5 = arith.constant 0 : index
    %c0_6 = arith.constant 0 : index
    %4 = vector.load %arg4[%c0_4, %c0_5, %c0_6] : memref<1x8x256xf32, #tpu.memory_space<vmem>>, vector<1x4x256xf32>
    %5 = vector.shape_cast %4 : vector<1x4x256xf32> to vector<4x256xf32>
    %6 = vector.shape_cast %3 : vector<4x256xf32> to vector<1x4x256xf32>
    tpu.vector_store %arg4[%c0_4, %c0_5, %c0_6], %6 {strides = array<i32>} : memref<1x8x256xf32, #tpu.memory_space<vmem>>, vector<1x4x256xf32>,
    %c0_7 = arith.constant 0 : index
    %c0_8 = arith.constant 0 : index
    %c0_9 = arith.constant 0 : index
    %7 = vector.load %arg2[%c0_7, %c0_8, %c0_9] : memref<1x4x256xf32, #tpu.memory_space<vmem>>, vector<1x4x256xf32>
    %8 = vector.shape_cast %7 : vector<1x4x256xf32> to vector<4x256xf32>
    %c0_10 = arith.constant 0 : index
    %c4 = arith.constant 4 : index
    %c0_11 = arith.constant 0 : index
    %9 = vector.load %arg4[%c0_10, %c4, %c0_11] : memref<1x8x256xf32, #tpu.memory_space<vmem>>, vector<1x4x256xf32>
    %10 = vector.shape_cast %9 : vector<1x4x256xf32> to vector<4x256xf32>
    %11 = vector.shape_cast %8 : vector<4x256xf32> to vector<1x4x256xf32>
    tpu.vector_store %arg4[%c0_10, %c4, %c0_11], %11 {strides = array<i32>} : memref<1x8x256xf32, #tpu.memory_space<vmem>>, vector<1x4x256xf32>,
    return
  }
  func.func @transform_0(%arg0: i32) -> (i32, i32, i32) {
    %c0_i32 = arith.constant 0 : i32
    %c0_i32_0 = arith.constant 0 : i32
    %c0_i32_1 = arith.constant 0 : i32
    return %arg0, %c0_i32, %c0_i32_0 : i32, i32, i32
  }
  func.func @transform_1(%arg0: i32) -> (i32, i32, i32) {
    %c0_i32 = arith.constant 0 : i32
    %c0_i32_0 = arith.constant 0 : i32
    %c0_i32_1 = arith.constant 0 : i32
    return %arg0, %c0_i32, %c0_i32_0 : i32, i32, i32
  }
  func.func @transform_2(%arg0: i32) -> (i32, i32) {
    %c0_i32 = arith.constant 0 : i32
    %c0_i32_0 = arith.constant 0 : i32
    %c0_i32_1 = arith.constant 0 : i32
    return %c0_i32, %c0_i32_0 : i32, i32
  }
  func.func @transform_3(%arg0: i32) -> (i32, i32, i32) {
    %c0_i32 = arith.constant 0 : i32
    %c0_i32_0 = arith.constant 0 : i32
    %c0_i32_1 = arith.constant 0 : i32
    return %arg0, %c0_i32, %c0_i32_0 : i32, i32, i32
  }
}

</mosaic_0001>

<bundles_post_ra>
// kernel: concat_block.1
= control target key start
LH: loop header
LB: loop body
LE: loop exit
PB: predicated region body
PF: predicated region fallthrough
CT: control target
= control target key end

     0   :  { %s416_s12 = smov 0   ;;  %s444_s0 = inlined_call_operand.vmem [shape: f32[2,37,256], index: 0, kind: input, shape index: {}]   ;;  %s445_s1 = inlined_call_operand.vmem [shape: f32[2,4,256], index: 1, kind: input, shape index: {}]   ;;  %s446_s2 = inlined_call_operand.vmem [shape: f32[4,37], index: 2, kind: input, shape index: {}]   ;;  %s447_s3 = inlined_call_operand.vmem [shape: f32[2,8,256], index: 3, kind: output, shape index: {}]  }
   0x1 LB: > { %s359_s13 = sadd.s32 4294967295, %s393_s12   ;;  %p363_p0 = scmp.ge.s32.totalorder %s393_s12, 1  ;;  %s393_s12 = sphi %s416_s12, %s13_s12  }
   0x2   : > { %p147_p1 = scmp.lt.s32.totalorder %s393_s12, 3 }
   0x4   : > { %p148_p2 = pnand %p363_p0, %p147_p1 }
   0x5   : > { %p176_p3 = scmp.lt.s32.totalorder (!%p148_p2), %s359_s13, 1 }
   0x6   : > { %151 = sbr.rel (%p148_p2) target bundleno = 222 (0xde), region = 32 }
   0xb   : > { %v395_v0 = vmov 0.0   ;;  %s449_s13 = smov (!%p176_p3, %s359_s13), 1  ;;  %vm206_vm0 = vcmask 1044480   ;;  %v191_v11 = vld [vmem:[%s446_s2] sm:$0xf]  ;;  %vm202_vm1 = vcmask 302080  }
   0xc   : > { %277 = vmatprep.mubr.f32.mxu0 %v395_v0  ;;  %s376_s14 = smul.u32 80, %s449_s13  ;;  %s374_s20 = sshll.u32 %s449_s13, 3 }
   0xd   : > { %s185_s23 = scalar_lea.vmem %s445_s1, %s374_s20  ;;  %s375_s24 = sshll.u32 %s449_s13, 4 }
   0xe   : > { %s180_s17 = scalar_lea.vmem %s444_s0, %s376_s14  ;;  %s190_s27 = scalar_lea.vmem %s447_s3, %s375_s24  ;;  %v286_v12 = vld [vmem:[%s185_s23] sm:$0xff] }
   0xf   : > { %v201_v1 = vld [vmem:[%s180_s17 + $0x48] sm:$0x1f]  ;;  %v200_v2 = vld [vmem:[%s180_s17 + $0x40] sm:$0x1f]  ;;  %v199_v3 = vld [vmem:[%s180_s17 + $0x38] sm:$0xff]  ;;  %v288_v13 = vcombine.low %v286_v12, %v286_v12 }
  0x10   : > { %369 = vmatprep.subr.msk.mxu0 %vm206_vm0, %v201_v1  ;;  %v198_v4 = vld [vmem:[%s180_s17 + $0x30] sm:$0xff]  ;;  %v197_v5 = vld [vmem:[%s180_s17 + $0x28] sm:$0xff]  ;;  %v196_v6 = vld [vmem:[%s180_s17 + $0x20] sm:$0xff]  ;;  %291 = vst [vmem:[%s190_s27 + $0x8] sm:$0xf0] %v286_v12 }
  0x11   : > { %370 = vmatpush1.msk.msra.mxu0 %vm206_vm0, %v200_v2  ;;  %v195_v7 = vld [vmem:[%s180_s17 + $0x18] sm:$0xff]  ;;  %v194_v8 = vld [vmem:[%s180_s17 + $0x10] sm:$0xff]  ;;  %v193_v9 = vld [vmem:[%s180_s17 + $0x8] sm:$0xff]  ;;  %290 = vst [vmem:[%s190_s27] sm:$0xf0] %v288_v13 }
  0x12   : > { %237 = vmatprep.subr.mxu0 %v199_v3  ;;  %v192_v10 = vld [vmem:[%s180_s17] sm:$0xff] }
  0x13   : > { %238 = vmatpush1.msra.mxu0 %v198_v4 }
  0x14   : > { %239 = vmatprep.subr.mxu0 %v197_v5 }
  0x15   : > { %240 = vmatpush1.msra.mxu0 %v196_v6 }
  0x16   : > { %241 = vmatprep.subr.mxu0 %v195_v7 }
  0x17   : > { %242 = vmatpush1.msra.mxu0 %v194_v8 }
  0x18   : > { %243 = vmatprep.subr.mxu0 %v193_v9 }
  0x19   : > { %244 = vmatpush1.msra.mxu0 %v192_v10 }
  0x1a   : > { %371 = vmatmul.mubr.msk.f32.vlgmr.msra.gmra.mxu0 %vm202_vm1, %v191_v11 }
  0xda   : > { %v279_v14 = vpop.f32.mrf.mxu0 }
  0xdb   : > { %284 = vst [vmem:[%s190_s27] sm:$0xf] %v279_v14 }
  0xdc   : > { %v281_v15 = vpop.f32.mrf.mxu0 }
  0xdd   : > { %285 = vst [vmem:[%s190_s27 + $0x8] sm:$0xf] %v281_v15 }
  0xde PF: > { %s13_s12 = sadd.s32 1, %s393_s12  }
  0xdf   : > { %p10_p4 = scmp.ge.s32.totalorder %s13_s12, 4  }
  0xe1   :  { %12 = sbr.rel (!%p10_p4) target bundleno = 1 (0x1), region = 65 }

</bundles_post_ra>
